<compile_context>
chip_gen: v7x
topology: tpu7x:2x2x1
jax: 0.10.0
libtpu: 0.0.40
codegen_flags: <defaults>
</compile_context>

<pallas_src>
import jax
import jax.numpy as jnp
from jax.experimental import pallas as pl
from jax.experimental.pallas import tpu as pltpu

L = 1000          # feature dim (resnet fc output / self.L)
LP = 1024         # L padded to a multiple of 128 -> lane-dense vregs / MXU tiles
D = 128           # attention hidden dim (self.D)
K = 1             # attention heads (self.K)


def _round_up(x, m):
    return (x + m - 1) // m * m


# ----------------------------------------------------------------------------
# Fused kernel: one bag (N instances) per grid step.
# ----------------------------------------------------------------------------
def _mil_fused_kernel(x_ref, wf_ref, bf_ref, w1_ref, b1_ref, w2t_ref, wc_ref,
                      yp_ref, a_ref):
    """Per-bag fused surrogate-extractor + gated-attention MIL head.

    x_ref  : (1, C, N, HW) f32   channel-major instance pixels of this bag
    wf_ref : (C, LP)  f32        surrogate extractor weight (L zero-padded)
    bf_ref : (1, LP)  f32        surrogate extractor bias   (L zero-padded)
    w1_ref : (LP, D)  bf16       attention Linear(L, D) weight (zero-padded)
    b1_ref : (1, D)   f32
    w2t_ref: (1, D)   f32        attention Linear(D, K=1) weight (transposed)
    wc_ref : (1, LP)  f32        classifier Linear(L, 1) weight (zero-padded)
    yp_ref : (1, 1, 1)  f32      raw classifier output (bias added in wrapper)
    a_ref  : (1, 1, NP) f32      attention weights, lane-padded to NP (zeros)
    """
    xb = x_ref[0]                                    # (C, N, HW)
    n_ch, n_inst, hw = xb.shape
    lp = wf_ref.shape[1]

    # ---- surrogate feature extractor: GAP over HW, then Linear(C -> LP) ----
    # C == 3: a static loop of cheap (N,1)x(1,LP) VPU broadcast-FMAs over the
    # whole batched instance tile (negligible next to the LPxD matmul below).
    feat = jnp.zeros((n_inst, lp), jnp.float32)
    inv_hw = 1.0 / hw
    for c in range(n_ch):
        pooled_c = jnp.sum(xb[c], axis=-1, keepdims=True) * inv_hw   # (N, 1)
        feat = feat + pooled_c * wf_ref[c:c + 1, :]                  # (N, LP)
    feat = feat + bf_ref[...]

    # ---- gated attention MIL head ------------------------------------------
    # bf16 operands for the (N, LP) x (LP, D) MXU matmul, f32 accumulation.
    t = jnp.tanh(
        jnp.dot(feat.astype(jnp.bfloat16), w1_ref[...],
                preferred_element_type=jnp.float32) + b1_ref[...])   # (N, D)
    # logits laid out (1, N) (lane dim = N).  The Linear(D,1) bias b2 is a
    # constant over N and cancels inside the softmax -> not needed in-kernel.
    logits = jax.lax.dot_general(
        w2t_ref[...], t, (((1,), (1,)), ((), ())),
        preferred_element_type=jnp.float32)                          # (1, N)
    m = jnp.max(logits, axis=-1, keepdims=True)
    e = jnp.exp(logits - m)
    a = e / jnp.sum(e, axis=-1, keepdims=True)                       # (1, N)

    bag = jnp.dot(a, feat, preferred_element_type=jnp.float32)       # (1, LP)
    yp = jax.lax.dot_general(
        bag, wc_ref[...], (((1,), (1,)), ((), ())),
        preferred_element_type=jnp.float32)                          # (1, 1)
    yp_ref[0] = yp

    # Lane-dense store of A: scatter the N attention weights into the first N
    # lanes of a 128-aligned row (zeros elsewhere) via a tiny MXU matmul so
    # the output store is a full-lane (unmasked) vst.
    n_pad = a_ref.shape[2]
    if n_pad == n_inst:
        a_ref[0] = a
    else:
        row = jax.lax.broadcasted_iota(jnp.int32, (n_inst, n_pad), 0)
        col = jax.lax.broadcasted_iota(jnp.int32, (n_inst, n_pad), 1)
        scatter = (row == col).astype(jnp.float32)                   # (N, NP)
        a_ref[0] = jnp.dot(a, scatter, preferred_element_type=jnp.float32)


# ----------------------------------------------------------------------------
# Wrapper: layout plumbing (reshape / pad / bf16 cast) + the pallas_call.
# ----------------------------------------------------------------------------
@jax.jit
def attention_slide_batch_forward(x, params):
    """x: (B, N, C, H, W) -> (Y_prob (B,), Y_hat (B,), A (B, N))."""
    B, N, C, Hh, Ww = x.shape
    HW = Hh * Ww
    NP = _round_up(N, 128)

    # channel-major per-bag layout: (B, C, N, HW); minor block dims (N, HW)
    # are (8, 128) friendly and each channel slice is a clean 2-D tile.
    x_cm = jnp.transpose(x.reshape(B, N, C, HW).astype(jnp.float32),
                         (0, 2, 1, 3))

    # Pad the L (=1000) axis once to LP (=1024): every in-kernel matmul and
    # store becomes lane dense; padded rows/cols are zero so results match.
    wf_p = jnp.pad(params["wf"], ((0, 0), (0, LP - L)))
    bf_p = jnp.pad(params["bf"], ((0, 0), (0, LP - L)))
    w1_p = jnp.pad(params["w1"], ((0, LP - L), (0, 0))).astype(jnp.bfloat16)
    wc_p = jnp.pad(params["wc"], ((0, 0), (0, LP - L)))

    cost = pl.CostEstimate(
        flops=2 * B * N * (C * HW + C * LP + LP * D + D + LP)
              + 2 * B * (LP + N * NP),
        transcendentals=B * N * (D + 1),
        bytes_accessed=(B * C * N * HW * 4                        # x
                        + (C + 2) * LP * 4 + LP * D * 2 + 2 * D * 4  # params
                        + B * (NP + 1) * 4),                      # outputs
    )

    # TODO(synk): for large MIL bags (N >> 1024) tile N with a second
    # ("arbitrary") grid axis and an online-softmax / M accumulator in VMEM
    # scratch -- mandatory within v7x's 64 MiB VMEM, beneficial on v5e/v6e.
    yp_lin, a_pad = pl.pallas_call(
        _mil_fused_kernel,
        out_shape=(
            jax.ShapeDtypeStruct((B, 1, 1), jnp.float32),
            jax.ShapeDtypeStruct((B, 1, NP), jnp.float32),
        ),
        grid=(B,),
        in_specs=[
            pl.BlockSpec((1, C, N, HW), lambda b: (b, 0, 0, 0)),
            pl.BlockSpec((C, LP), lambda b: (0, 0)),
            pl.BlockSpec((1, LP), lambda b: (0, 0)),
            pl.BlockSpec((LP, D), lambda b: (0, 0)),
            pl.BlockSpec((1, D), lambda b: (0, 0)),
            pl.BlockSpec((1, D), lambda b: (0, 0)),
            pl.BlockSpec((1, LP), lambda b: (0, 0)),
        ],
        out_specs=(
            pl.BlockSpec((1, 1, 1), lambda b: (b, 0, 0)),
            pl.BlockSpec((1, 1, NP), lambda b: (b, 0, 0)),
        ),
        compiler_params=pltpu.CompilerParams(
            dimension_semantics=("parallel",)),
        cost_estimate=cost,
    )(x_cm, wf_p, bf_p, w1_p, params["b1"], params["w2t"], wc_p)

    # Classifier bias + 0.5 threshold are O(B) scalar ops: do them in the
    # wrapper (keeps scalar params out of the kernel per review feedback).
    y_prob = yp_lin.reshape(B) + params["bc"][0, 0]
    y_hat = (y_prob >= 0.5).astype(jnp.float32)     # torch.ge(Y_prob, 0.5)
    A = a_pad[:, 0, :N]
    return y_prob, y_hat, A


# ----------------------------------------------------------------------------
# Pure-JAX reference of the same surrogate model (for correctness check).
# ----------------------------------------------------------------------------
def reference_forward(x, params):
    B, N, C, Hh, Ww = x.shape
    xf = x.reshape(B * N, C, Hh * Ww).astype(jnp.float32)
    pooled = xf.mean(axis=2)                                          # (BN, C)
    Hfeat = pooled @ params["wf"] + params["bf"][0]                   # (BN, L)
    logits = (jnp.tanh(Hfeat @ params["w1"] + params["b1"][0])
              @ params["w2t"][0] + params["b2"][0, 0])                # (BN,)
    A = jax.nn.softmax(logits.reshape(B, N, K).transpose(0, 2, 1), axis=2)
    Hb = Hfeat.reshape(B, N, L)
    M = jnp.einsum("bkn,bnl->bkl", A, Hb)[:, 0]                       # (B, L)
    Yp = M @ params["wc"][0] + params["bc"][0, 0]
    Yh = (Yp >= 0.5).astype(jnp.float32)
    return Yp, Yh, A[:, 0]


def make_params(key):
    ks = jax.random.split(key, 6)
    return {
        # surrogate feature extractor (stands in for resnet34)
        "wf": jax.random.normal(ks[0], (3, L), jnp.float32) * 0.1,
        "bf": jax.random.normal(ks[1], (1, L), jnp.float32) * 0.1,
        # attention: Linear(L, D), Tanh, Linear(D, K=1)
        "w1": jax.random.normal(ks[2], (L, D), jnp.float32) * 0.02,
        "b1": jnp.zeros((1, D), jnp.float32),
        "w2t": jax.random.normal(ks[3], (1, D), jnp.float32) * 0.05,
        "b2": jnp.zeros((1, 1), jnp.float32),
        # classifier: Linear(L*K, 1)
        "wc": jax.random.normal(ks[4], (1, L), jnp.float32) * 0.02,
        "bc": jax.random.normal(ks[5], (1, 1), jnp.float32) * 0.1,
    }


if __name__ == "__main__":
    key = jax.random.PRNGKey(0)
    kx, kp = jax.random.split(key)
    B, N, C, Hh, Ww = 2, 8, 3, 16, 16          # x: (B, N, C, H, W)
    x = jax.random.normal(kx, (B, N, C, Hh, Ww), jnp.float32)
    params = make_params(kp)

    y_prob, y_hat, A = attention_slide_batch_forward(x, params)
    jax.block_until_ready((y_prob, y_hat, A))

    # sanity check against pure-JAX reference (tolerance covers bf16 matmul)
    yp_ref, yh_ref, A_ref = reference_forward(x, params)
    assert y_prob.shape == (B,) and y_hat.shape == (B,) and A.shape == (B, N)
    assert jnp.allclose(y_prob, yp_ref, rtol=5e-2, atol=5e-2)
    assert jnp.allclose(A, A_ref, rtol=5e-2, atol=5e-2)
    assert jnp.allclose(A.sum(axis=1), jnp.ones((B,)), atol=1e-3)

    print("KERNEL_OK")
</pallas_src>

<mosaic_0001>
module attributes {stable_mosaic.version = 11 : i64} {
  func.func @_mil_fused_kernel(%arg0: i32, %arg1: memref<1x3x8x256xf32, #tpu.memory_space<vmem>>, %arg2: memref<3x1024xf32, #tpu.memory_space<vmem>>, %arg3: memref<1x1024xf32, #tpu.memory_space<vmem>>, %arg4: memref<1024x128xbf16, #tpu.memory_space<vmem>>, %arg5: memref<1x128xf32, #tpu.memory_space<vmem>>, %arg6: memref<1x128xf32, #tpu.memory_space<vmem>>, %arg7: memref<1x1024xf32, #tpu.memory_space<vmem>>, %arg8: memref<1x1x1xf32, #tpu.memory_space<vmem>>, %arg9: memref<1x1x128xf32, #tpu.memory_space<vmem>>) attributes {dimension_semantics = [#tpu.dimension_semantics<parallel>], iteration_bounds = array<i64: 2>, scalar_prefetch = 0 : i64, scratch_operands = 0 : i64, tpu.core_type = #tpu.core_type<tc>, window_params = [{transform_indices = @transform_0, window_bounds = array<i64: 1, 3, 8, 256>}, {pipeline_mode = #tpu.pipeline_mode<synchronous>, transform_indices = @transform_1, window_bounds = array<i64: 3, 1024>}, {pipeline_mode = #tpu.pipeline_mode<synchronous>, transform_indices = @transform_2, window_bounds = array<i64: 1, 1024>}, {pipeline_mode = #tpu.pipeline_mode<synchronous>, transform_indices = @transform_3, window_bounds = array<i64: 1024, 128>}, {pipeline_mode = #tpu.pipeline_mode<synchronous>, transform_indices = @transform_4, window_bounds = array<i64: 1, 128>}, {pipeline_mode = #tpu.pipeline_mode<synchronous>, transform_indices = @transform_5, window_bounds = array<i64: 1, 128>}, {pipeline_mode = #tpu.pipeline_mode<synchronous>, transform_indices = @transform_6, window_bounds = array<i64: 1, 1024>}, {transform_indices = @transform_7, window_bounds = array<i64: 1, 1, 1>}, {transform_indices = @transform_8, window_bounds = array<i64: 1, 1, 128>}]} {
    %c0 = arith.constant 0 : index
    %c0_0 = arith.constant 0 : index
    %c0_1 = arith.constant 0 : index
    %c0_2 = arith.constant 0 : index
    %0 = vector.load %arg1[%c0, %c0_0, %c0_1, %c0_2] : memref<1x3x8x256xf32, #tpu.memory_space<vmem>>, vector<1x3x8x256xf32>
    %1 = vector.shape_cast %0 : vector<1x3x8x256xf32> to vector<3x8x256xf32>
    %cst = arith.constant 0.000000e+00 : f32
    %2 = vector.broadcast %cst : f32 to vector<8x1024xf32>
    %3 = vector.extract_strided_slice %1 {offsets = [0, 0, 0], sizes = [1, 8, 256], strides = [1, 1, 1]} : vector<3x8x256xf32> to vector<1x8x256xf32>
    %4 = vector.shape_cast %3 : vector<1x8x256xf32> to vector<8x256xf32>
    %cst_3 = arith.constant dense<0.000000e+00> : vector<8xf32>
    %5 = vector.multi_reduction <add>, %4, %cst_3 [1] : vector<8x256xf32> to vector<8xf32>
    %6 = vector.shape_cast %5 : vector<8xf32> to vector<8x1xf32>
    %cst_4 = arith.constant 3.906250e-03 : f32
    %7 = vector.broadcast %cst_4 : f32 to vector<8x1xf32>
    %8 = arith.mulf %6, %7 : vector<8x1xf32>
    %c0_5 = arith.constant 0 : index
    %c0_6 = arith.constant 0 : index
    %9 = vector.load %arg2[%c0_5, %c0_6] : memref<3x1024xf32, #tpu.memory_space<vmem>>, vector<1x1024xf32>
    %10 = vector.broadcast %8 : vector<8x1xf32> to vector<8x1024xf32>
    %11 = vector.broadcast %9 : vector<1x1024xf32> to vector<8x1024xf32>
    %12 = arith.mulf %10, %11 : vector<8x1024xf32>
    %13 = arith.addf %2, %12 : vector<8x1024xf32>
    %14 = vector.extract_strided_slice %1 {offsets = [1, 0, 0], sizes = [1, 8, 256], strides = [1, 1, 1]} : vector<3x8x256xf32> to vector<1x8x256xf32>
    %15 = vector.shape_cast %14 : vector<1x8x256xf32> to vector<8x256xf32>
    %cst_7 = arith.constant dense<0.000000e+00> : vector<8xf32>
    %16 = vector.multi_reduction <add>, %15, %cst_7 [1] : vector<8x256xf32> to vector<8xf32>
    %17 = vector.shape_cast %16 : vector<8xf32> to vector<8x1xf32>
    %cst_8 = arith.constant 3.906250e-03 : f32
    %18 = vector.broadcast %cst_8 : f32 to vector<8x1xf32>
    %19 = arith.mulf %17, %18 : vector<8x1xf32>
    %c1 = arith.constant 1 : index
    %c0_9 = arith.constant 0 : index
    %20 = vector.load %arg2[%c1, %c0_9] : memref<3x1024xf32, #tpu.memory_space<vmem>>, vector<1x1024xf32>
    %21 = vector.broadcast %19 : vector<8x1xf32> to vector<8x1024xf32>
    %22 = vector.broadcast %20 : vector<1x1024xf32> to vector<8x1024xf32>
    %23 = arith.mulf %21, %22 : vector<8x1024xf32>
    %24 = arith.addf %13, %23 : vector<8x1024xf32>
    %25 = vector.extract_strided_slice %1 {offsets = [2, 0, 0], sizes = [1, 8, 256], strides = [1, 1, 1]} : vector<3x8x256xf32> to vector<1x8x256xf32>
    %26 = vector.shape_cast %25 : vector<1x8x256xf32> to vector<8x256xf32>
    %cst_10 = arith.constant dense<0.000000e+00> : vector<8xf32>
    %27 = vector.multi_reduction <add>, %26, %cst_10 [1] : vector<8x256xf32> to vector<8xf32>
    %28 = vector.shape_cast %27 : vector<8xf32> to vector<8x1xf32>
    %cst_11 = arith.constant 3.906250e-03 : f32
    %29 = vector.broadcast %cst_11 : f32 to vector<8x1xf32>
    %30 = arith.mulf %28, %29 : vector<8x1xf32>
    %c2 = arith.constant 2 : index
    %c0_12 = arith.constant 0 : index
    %31 = vector.load %arg2[%c2, %c0_12] : memref<3x1024xf32, #tpu.memory_space<vmem>>, vector<1x1024xf32>
    %32 = vector.broadcast %30 : vector<8x1xf32> to vector<8x1024xf32>
    %33 = vector.broadcast %31 : vector<1x1024xf32> to vector<8x1024xf32>
    %34 = arith.mulf %32, %33 : vector<8x1024xf32>
    %35 = arith.addf %24, %34 : vector<8x1024xf32>
    %c0_13 = arith.constant 0 : index
    %c0_14 = arith.constant 0 : index
    %36 = vector.load %arg3[%c0_13, %c0_14] : memref<1x1024xf32, #tpu.memory_space<vmem>>, vector<1x1024xf32>
    %37 = vector.broadcast %36 : vector<1x1024xf32> to vector<8x1024xf32>
    %38 = arith.addf %35, %37 : vector<8x1024xf32>
    %39 = arith.truncf %38 : vector<8x1024xf32> to vector<8x1024xbf16>
    %c0_15 = arith.constant 0 : index
    %c0_16 = arith.constant 0 : index
    %40 = vector.load %arg4[%c0_15, %c0_16] : memref<1024x128xbf16, #tpu.memory_space<vmem>>, vector<1024x128xbf16>
    %cst_17 = arith.constant dense<0.000000e+00> : vector<8x128xf32>
    %41 = tpu.matmul %39, %40, %cst_17 {dimension_numbers = #tpu.dot_dimension_numbers<[1], [0], [0], [1], [0, 0, 1, 1], [], []>} : vector<8x1024xbf16>, vector<1024x128xbf16>, vector<8x128xf32> -> vector<8x128xf32>
    %c0_18 = arith.constant 0 : index
    %c0_19 = arith.constant 0 : index
    %42 = vector.load %arg5[%c0_18, %c0_19] : memref<1x128xf32, #tpu.memory_space<vmem>>, vector<1x128xf32>
    %43 = vector.broadcast %42 : vector<1x128xf32> to vector<8x128xf32>
    %44 = arith.addf %41, %43 : vector<8x128xf32>
    %45 = math.tanh %44 : vector<8x128xf32>
    %c0_20 = arith.constant 0 : index
    %c0_21 = arith.constant 0 : index
    %46 = vector.load %arg6[%c0_20, %c0_21] : memref<1x128xf32, #tpu.memory_space<vmem>>, vector<1x128xf32>
    %cst_22 = arith.constant dense<0.000000e+00> : vector<1x8xf32>
    %47 = tpu.matmul %46, %45, %cst_22 {dimension_numbers = #tpu.dot_dimension_numbers<[1], [1], [0], [0], [0, 0, 1, 0], [], []>} : vector<1x128xf32>, vector<8x128xf32>, vector<1x8xf32> -> vector<1x8xf32>
    %cst_23 = arith.constant dense<0xFF800000> : vector<1xf32>
    %48 = vector.multi_reduction <maximumf>, %47, %cst_23 [1] : vector<1x8xf32> to vector<1xf32>
    %49 = vector.shape_cast %48 : vector<1xf32> to vector<1x1xf32>
    %50 = vector.broadcast %49 : vector<1x1xf32> to vector<1x8xf32>
    %51 = arith.subf %47, %50 : vector<1x8xf32>
    %52 = math.exp %51 : vector<1x8xf32>
    %cst_24 = arith.constant dense<0.000000e+00> : vector<1xf32>
    %53 = vector.multi_reduction <add>, %52, %cst_24 [1] : vector<1x8xf32> to vector<1xf32>
    %54 = vector.shape_cast %53 : vector<1xf32> to vector<1x1xf32>
    %55 = vector.broadcast %54 : vector<1x1xf32> to vector<1x8xf32>
    %56 = arith.divf %52, %55 : vector<1x8xf32>
    %cst_25 = arith.constant dense<0.000000e+00> : vector<1x1024xf32>
    %57 = tpu.matmul %56, %38, %cst_25 {dimension_numbers = #tpu.dot_dimension_numbers<[1], [0], [0], [1], [0, 0, 1, 1], [], []>} : vector<1x8xf32>, vector<8x1024xf32>, vector<1x1024xf32> -> vector<1x1024xf32>
    %c0_26 = arith.constant 0 : index
    %c0_27 = arith.constant 0 : index
    %58 = vector.load %arg7[%c0_26, %c0_27] : memref<1x1024xf32, #tpu.memory_space<vmem>>, vector<1x1024xf32>
    %cst_28 = arith.constant dense<0.000000e+00> : vector<1x1xf32>
    %59 = tpu.matmul %57, %58, %cst_28 {dimension_numbers = #tpu.dot_dimension_numbers<[1], [1], [0], [0], [0, 0, 1, 0], [], []>} : vector<1x1024xf32>, vector<1x1024xf32>, vector<1x1xf32> -> vector<1x1xf32>
    %c0_29 = arith.constant 0 : index
    %c0_30 = arith.constant 0 : index
    %c0_31 = arith.constant 0 : index
    %60 = vector.load %arg8[%c0_29, %c0_30, %c0_31] : memref<1x1x1xf32, #tpu.memory_space<vmem>>, vector<1x1x1xf32>
    %61 = vector.shape_cast %60 : vector<1x1x1xf32> to vector<1x1xf32>
    %62 = vector.shape_cast %59 : vector<1x1xf32> to vector<1x1x1xf32>
    tpu.vector_store %arg8[%c0_29, %c0_30, %c0_31], %62 {strides = array<i32>} : memref<1x1x1xf32, #tpu.memory_space<vmem>>, vector<1x1x1xf32>,
    %63 = tpu.iota {dimensions = array<i32: 0>} : vector<8x128xi32>
    %64 = tpu.iota {dimensions = array<i32: 1>} : vector<8x128xi32>
    %65 = arith.cmpi eq, %63, %64 : vector<8x128xi32>
    %66 = arith.extui %65 : vector<8x128xi1> to vector<8x128xi32>
    %67 = arith.sitofp %66 : vector<8x128xi32> to vector<8x128xf32>
    %cst_32 = arith.constant dense<0.000000e+00> : vector<1x128xf32>
    %68 = tpu.matmul %56, %67, %cst_32 {dimension_numbers = #tpu.dot_dimension_numbers<[1], [0], [0], [1], [0, 0, 1, 1], [], []>} : vector<1x8xf32>, vector<8x128xf32>, vector<1x128xf32> -> vector<1x128xf32>
    %c0_33 = arith.constant 0 : index
    %c0_34 = arith.constant 0 : index
    %c0_35 = arith.constant 0 : index
    %69 = vector.load %arg9[%c0_33, %c0_34, %c0_35] : memref<1x1x128xf32, #tpu.memory_space<vmem>>, vector<1x1x128xf32>
    %70 = vector.shape_cast %69 : vector<1x1x128xf32> to vector<1x128xf32>
    %71 = vector.shape_cast %68 : vector<1x128xf32> to vector<1x1x128xf32>
    tpu.vector_store %arg9[%c0_33, %c0_34, %c0_35], %71 {strides = array<i32>} : memref<1x1x128xf32, #tpu.memory_space<vmem>>, vector<1x1x128xf32>,
    return
  }
  func.func @transform_0(%arg0: i32) -> (i32, i32, i32, i32) {
    %c0_i32 = arith.constant 0 : i32
    %c0_i32_0 = arith.constant 0 : i32
    %c0_i32_1 = arith.constant 0 : i32
    %c0_i32_2 = arith.constant 0 : i32
    return %arg0, %c0_i32, %c0_i32_0, %c0_i32_1 : i32, i32, i32, i32
  }
  func.func @transform_1(%arg0: i32) -> (i32, i32) {
    %c0_i32 = arith.constant 0 : i32
    %c0_i32_0 = arith.constant 0 : i32
    %c0_i32_1 = arith.constant 0 : i32
    return %c0_i32, %c0_i32_0 : i32, i32
  }
  func.func @transform_2(%arg0: i32) -> (i32, i32) {
    %c0_i32 = arith.constant 0 : i32
    %c0_i32_0 = arith.constant 0 : i32
    %c0_i32_1 = arith.constant 0 : i32
    return %c0_i32, %c0_i32_0 : i32, i32
  }
  func.func @transform_3(%arg0: i32) -> (i32, i32) {
    %c0_i32 = arith.constant 0 : i32
    %c0_i32_0 = arith.constant 0 : i32
    %c0_i32_1 = arith.constant 0 : i32
    return %c0_i32, %c0_i32_0 : i32, i32
  }
  func.func @transform_4(%arg0: i32) -> (i32, i32) {
    %c0_i32 = arith.constant 0 : i32
    %c0_i32_0 = arith.constant 0 : i32
    %c0_i32_1 = arith.constant 0 : i32
    return %c0_i32, %c0_i32_0 : i32, i32
  }
  func.func @transform_5(%arg0: i32) -> (i32, i32) {
    %c0_i32 = arith.constant 0 : i32
    %c0_i32_0 = arith.constant 0 : i32
    %c0_i32_1 = arith.constant 0 : i32
    return %c0_i32, %c0_i32_0 : i32, i32
  }
  func.func @transform_6(%arg0: i32) -> (i32, i32) {
    %c0_i32 = arith.constant 0 : i32
    %c0_i32_0 = arith.constant 0 : i32
    %c0_i32_1 = arith.constant 0 : i32
    return %c0_i32, %c0_i32_0 : i32, i32
  }
  func.func @transform_7(%arg0: i32) -> (i32, i32, i32) {
    %c0_i32 = arith.constant 0 : i32
    %c0_i32_0 = arith.constant 0 : i32
    %c0_i32_1 = arith.constant 0 : i32
    return %arg0, %c0_i32, %c0_i32_0 : i32, i32, i32
  }
  func.func @transform_8(%arg0: i32) -> (i32, i32, i32) {
    %c0_i32 = arith.constant 0 : i32
    %c0_i32_0 = arith.constant 0 : i32
    %c0_i32_1 = arith.constant 0 : i32
    return %arg0, %c0_i32, %c0_i32_0 : i32, i32, i32
  }
}

</mosaic_0001>

<bundles_post_ra>
// kernel: attention_slide_batch_forward.1
= control target key start
LH: loop header
LB: loop body
LE: loop exit
PB: predicated region body
PF: predicated region fallthrough
CT: control target
= control target key end

     0   :  { %14 = vsyncpa [#allocation3], 0  ;;  %s2786_s0 = inlined_call_operand.vmem [shape: f32[2,3,8,256], index: 0, kind: input, shape index: {}]   ;;  %s2787_s1 = inlined_call_operand.vmem [shape: f32[3,1024], index: 1, kind: input, shape index: {}]   ;;  %s2788_s2 = inlined_call_operand.vmem [shape: f32[1,1024], index: 2, kind: input, shape index: {}]   ;;  %s2789_s3 = inlined_call_operand.vmem [shape: bf16[1024,128], index: 3, kind: input, shape index: {}]   ;;  %s2790_s4 = inlined_call_operand.vmem [shape: f32[1,128], index: 4, kind: input, shape index: {}]   ;;  %s2791_s5 = inlined_call_operand.vmem [shape: f32[1,128], index: 5, kind: input, shape index: {}]   ;;  %s2792_s6 = inlined_call_operand.vmem [shape: f32[1,1024], index: 6, kind: input, shape index: {}]   ;;  %s2793_s7 = inlined_call_operand.vmem [shape: f32[2,1,1], index: 7, kind: output, shape index: {0}]   ;;  %s2794_s8 = inlined_call_operand.hbm [shape: f32[2,1,128], index: 8, kind: output, shape index: {1}]  }
   0x1   :  { %16 = vsyncpa [#allocation3 + $0x1], 0  ;;  %s2267_s27 = smov 0   ;;  %s2269_s28 = smov 0  }
   0x2   :  { %s2271_s29 = smov 0   ;;  %s2273_s30 = smov 0  }
   0x3 LB: > { %s2288_s9 = sadd.s32 4294967295, %s2216_s30   ;;  %s1857_s10 = sadd.s32 4294967294, %s2216_s30   ;;  %s2216_s30 = sphi %s2273_s30, %s2800_s30   ;;  %s2212_s29 = sphi %s2271_s29, %s2799_s29   ;;  %s2208_s28 = sphi %s2269_s28, %s2798_s28   ;;  %s2204_s27 = sphi %s2267_s27, %s2797_s27  }
   0x4   : > { %s2292_s11 = sadd.s32 1, %s2216_s30   ;;  %s207_s12 = sadd.s32 1, %s2212_s29 }
   0x5   : > { %s204_s13 = ssub.s32 %s2216_s30, %s2292_s11  ;;  %p217_p0 = scmp.ne.s32.totalorder %s2212_s29, %s2208_s28 }
   0x6   : > { %p205_p1 = scmp.eq.s32.totalorder %s204_s13, 0  ;;  %p218_p2 = scmp.eq.s32.totalorder %s2288_s9, 1 }
   0x7   : > { %p223_p3 = scmp.ne.s32.totalorder %s2208_s28, %s2204_s27  ;;  %p224_p4 = scmp.eq.s32.totalorder %s1857_s10, 1 }
   0x8   : > { %s2303_s14 = scalar_select %p205_p1, %s2212_s29, %s207_s12  }
   0x9   : > { %p2305_p5 = por %p218_p2, %p217_p0  ;;  %p2309_p6 = por %p224_p4, %p223_p3 }
   0xa   : > { %p1860_p7 = scmp.ge.s32.totalorder %s2216_s30, 1  ;;  %p268_p8 = scmp.lt.s32.totalorder %s2216_s30, 3 }
   0xc   : > { %p269_p9 = pnand %p1860_p7, %p268_p8 }
   0xd   : > { %p304_p10 = scmp.lt.s32.totalorder (!%p269_p9), %s2288_s9, 1  ;;  %v2084_v0 = vld [vmem:[%s2789_s3 + $0x40] sm:$0xff] (!%p269_p9)   ;;  %v2088_v4 = vld [vmem:[%s2789_s3 + $0x48] sm:$0xff] (!%p269_p9)   ;;  %v2092_v17 = vld [vmem:[%s2789_s3 + $0x50] sm:$0xff] (!%p269_p9)   ;;  %v325_v43 = vlaneseq (!%p269_p9)  ;;  %vm2219_vm0 = vmmov (!%p269_p9), 0   ;;  %vm1316_vm1 = vcmask (!%p269_p9), 57344  }
   0xe   : > { %272 = sbr.rel (%p269_p9) target bundleno = 1352 (0x548), region = 48  ;;  %v2085_v1 = vld [vmem:[%s2789_s3 + $0xc0] sm:$0xff] (!%p269_p9)   ;;  %1939 = vmatprep.subr.bf16.mxu0 (!%p269_p9), %v2084_v0  ;;  %v2089_v5 = vld [vmem:[%s2789_s3 + $0xc8] sm:$0xff] (!%p269_p9)   ;;  %v2093_v18 = vld [vmem:[%s2789_s3 + $0xd0] sm:$0xff] (!%p269_p9)   ;;  %vm1328_vm2 = vcmask (!%p269_p9), 64512   ;;  %vm1666_vm4 = vcmask (!%p269_p9), 1040384  }
   0xf   : > { %v2086_v2 = vld [vmem:[%s2789_s3] sm:$0xff] (!%p269_p9)   ;;  %1961 = vmatprep.subr.bf16.mxu1 (!%p269_p9), %v2085_v1  ;;  %v2090_v6 = vld [vmem:[%s2789_s3 + $0x8] sm:$0xff] (!%p269_p9)   ;;  %v2094_v19 = vld [vmem:[%s2789_s3 + $0x10] sm:$0xff] (!%p269_p9)   ;;  %v2426_v44 = vshrl.u32 (!%p269_p9), %v325_v43, 7  ;;  %s302_s19 = sand.u32 (!%p269_p9), 1, %s2208_s28   ;;  %s1936_s23 = sshll.u32 (!%p269_p9), %s2288_s9, 4 }
  0x10   : > { %v2087_v3 = vld [vmem:[%s2789_s3 + $0x80] sm:$0xff] (!%p269_p9)   ;;  %1940 = vmatpush3.bf16.msra.mxu0 (!%p269_p9), %v2086_v2  ;;  %v2091_v15 = vld [vmem:[%s2789_s3 + $0x88] sm:$0xff] (!%p269_p9)   ;;  %v2095_v20 = vld [vmem:[%s2789_s3 + $0x90] sm:$0xff] (!%p269_p9)   ;;  %s1768_s10 = scalar_lea.sflag (!%p269_p9), [#allocation3], %s302_s19  ;;  %s2221_s13 = smov (!%p269_p9), [#allocation2]  }
  0x11   : > { %1962 = vmatpush3.bf16.msra.mxu1 (!%p269_p9), %v2087_v3  ;;  %1941 = vmatprep.subr.bf16.mxu0 (!%p269_p9), %v2088_v4  ;;  %v2096_v21 = vld [vmem:[%s2789_s3 + $0x58] sm:$0xff] (!%p269_p9)   ;;  %v2100_v25 = vld [vmem:[%s2789_s3 + $0x60] sm:$0xff] (!%p269_p9)   ;;  %v2104_v29 = vld [vmem:[%s2789_s3 + $0x68] sm:$0xff] (!%p269_p9)   ;;  %v2429_v45 = vsub.s32 (!%p269_p9), 1, %v2426_v44  ;;  %v2432_v46 = vsub.s32 (!%p269_p9), 3, %v2426_v44  ;;  %v2455_v51 = vsub.s32 (!%p269_p9), 0, %v2426_v44 }
  0x12   : > { %1963 = vmatprep.subr.bf16.mxu1 (!%p269_p9), %v2089_v5  ;;  %v2097_v22 = vld [vmem:[%s2789_s3 + $0xd8] sm:$0xff] (!%p269_p9)   ;;  %v2101_v26 = vld [vmem:[%s2789_s3 + $0xe0] sm:$0xff] (!%p269_p9)   ;;  %v2105_v30 = vld [vmem:[%s2789_s3 + $0xe8] sm:$0xff] (!%p269_p9)   ;;  %v2458_v52 = vsub.s32 (!%p269_p9), 2, %v2426_v44  ;;  %v2461_v53 = vsub.s32 (!%p269_p9), 5, %v2426_v44  ;;  %v2470_v57 = vsub.s32 (!%p269_p9), 7, %v2426_v44 }
  0x13   : > { %v2098_v23 = vld [vmem:[%s2789_s3 + $0x18] sm:$0xff] (!%p269_p9)   ;;  %v2102_v27 = vld [vmem:[%s2789_s3 + $0x20] sm:$0xff] (!%p269_p9)   ;;  %v2106_v31 = vld [vmem:[%s2789_s3 + $0x28] sm:$0xff] (!%p269_p9)   ;;  %s2158_s17 = sshll.u32 (!%p269_p9), %s2221_s13, 4  ;;  %s2159_s17 = int_to_ptr.vmem [resolvable:$false] %s2158_s17 }
  0x14   : > { %1942 = vmatpush3.bf16.msra.mxu0 (!%p269_p9), %v2090_v6  ;;  %v2099_v24 = vld [vmem:[%s2789_s3 + $0x98] sm:$0xff] (!%p269_p9)   ;;  %v2103_v28 = vld [vmem:[%s2789_s3 + $0xa0] sm:$0xff] (!%p269_p9)   ;;  %v2107_v32 = vld [vmem:[%s2789_s3 + $0xa8] sm:$0xff] (!%p269_p9)   ;;  %s2160_s18 = scalar_lea.vmem (!%p269_p9), %s2159_s17, 32 }
  0x15   : > { %s2323_s21 = scalar_select %p304_p10, %s2288_s9, 1  ;;  %1964 = vmatpush3.bf16.msra.mxu1 %v2091_v15  ;;  %1943 = vmatprep.subr.bf16.mxu0 %v2092_v17  ;;  %v2108_v33 = vld [vmem:[%s2789_s3 + $0x70] sm:$0xff]   ;;  %v2112_v37 = vld [vmem:[%s2789_s3 + $0x78] sm:$0xff]   ;;  %v2116_v41 = vld [vmem:[%s2789_s3 + $0x140] sm:$0xff]  }
  0x16   : > { %1965 = vmatprep.subr.bf16.mxu1 %v2093_v18  ;;  %v2109_v34 = vld [vmem:[%s2789_s3 + $0xf0] sm:$0xff]   ;;  %v2113_v38 = vld [vmem:[%s2789_s3 + $0xf8] sm:$0xff]   ;;  %v2117_v42 = vld [vmem:[%s2789_s3 + $0x1c0] sm:$0xff]  }
  0x17   : > { %s2041_s26 = smul.u32 48, %s2323_s21  ;;  %v2110_v35 = vld [vmem:[%s2789_s3 + $0x30] sm:$0xff]   ;;  %v2114_v39 = vld [vmem:[%s2789_s3 + $0x38] sm:$0xff]   ;;  %v2452_v50 = vld [vmem:[%s2788_s2] sm:$0xff] }
  0x18   : > { %1944 = vmatpush3.bf16.msra.mxu0 %v2094_v19  ;;  %v2111_v36 = vld [vmem:[%s2789_s3 + $0xb0] sm:$0xff]   ;;  %v2115_v40 = vld [vmem:[%s2789_s3 + $0xb8] sm:$0xff]   ;;  %v516_v58 = vrot.slane %v2452_v50, %v2429_v45  ;;  %v524_v63 = vrot.slane %v2452_v50, %v2432_v46  ;;  %v512_v5 = vrot.slane %v2452_v50, %v2455_v51 }
  0x19   : > { %s308_s20 = scalar_lea.vmem %s2786_s0, %s2041_s26  ;;  %1966 = vmatpush3.bf16.msra.mxu1 %v2095_v20  ;;  %1945 = vmatprep.subr.bf16.mxu0 %v2096_v21  ;;  %v2437_v47 = vld [vmem:[%s2787_s1] ss:$4 sm:$0xff]  ;;  %v2442_v48 = vld [vmem:[%s2787_s1 + $0x1] ss:$4 sm:$0xff]  ;;  %v2447_v49 = vld [vmem:[%s2787_s1 + $0x2] ss:$4 sm:$0xff]  ;;  %s1781_s26 = scalar_lea.hbm %s2794_s8, %s1936_s23 }
  0x1a   : > { %v313_v7 = vld [vmem:[%s308_s20] sm:$0xff]  ;;  %v314_v8 = vld [vmem:[%s308_s20 + $0x8] sm:$0xff]  ;;  %v315_v9 = vld [vmem:[%s308_s20 + $0x10] sm:$0xff]  ;;  %1967 = vmatprep.subr.bf16.mxu1 %v2097_v22  ;;  %v332_v54 = vrot.slane %v2437_v47, %v2429_v45  ;;  %v395_v55 = vrot.slane %v2442_v48, %v2429_v45  ;;  %v458_v56 = vrot.slane %v2447_v49, %v2429_v45  ;;  %v340_v59 = vrot.slane %v2437_v47, %v2432_v46 }
  0x1b   : > { %v319_v10 = vadd.f32 %v314_v8, %v313_v7  ;;  %v316_v11 = vld [vmem:[%s308_s20 + $0x18] sm:$0xff]  ;;  %v317_v12 = vld [vmem:[%s308_s20 + $0x20] sm:$0xff]  ;;  %v318_v13 = vld [vmem:[%s308_s20 + $0x28] sm:$0xff]  ;;  %v403_v60 = vrot.slane %v2442_v48, %v2432_v46  ;;  %v466_v61 = vrot.slane %v2447_v49, %v2432_v46  ;;  %v328_v0 = vrot.slane %v2437_v47, %v2455_v51  ;;  %s303_s20 = scalar_lea.vmem [#allocation2], %s302_s19 }
  0x1c   : > { %v444_v14 = vadd.f32 %v318_v13, %v317_v12  ;;  %v381_v16 = vadd.f32 %v316_v11, %v315_v9  ;;  %1946 = vmatpush3.bf16.msra.mxu0 %v2098_v23  ;;  %v391_v1 = vrot.slane %v2442_v48, %v2455_v51  ;;  %v454_v2 = vrot.slane %v2447_v49, %v2455_v51  ;;  %s1783_s22 = sshll.u32 %s303_s20, 4  ;;  %s2741_s22 = int_to_ptr.vmem [resolvable:$true] %s1783_s22 }
  0x1d   : > { %320 = vadd.xlane.f32.xlu0 %v319_v10  ;;  %1968 = vmatpush3.bf16.msra.mxu1 %v2099_v24  ;;  %v336_v6 = vrot.slane %v2437_v47, %v2458_v52  ;;  %v399_v7 = vrot.slane %v2442_v48, %v2458_v52  ;;  %v462_v9 = vrot.slane %v2447_v49, %v2458_v52  ;;  %s2154_s12 = scalar_lea.vmem %s2741_s22, 16  ;;  %p2161_p0 = scmp.lt.s32.totalorder %s2741_s22, %s2159_s17 }
  0x1e   : > { %445 = vadd.xlane.f32.xlu1 %v444_v14  ;;  %1947 = vmatprep.subr.bf16.mxu0 %v2100_v25  ;;  %v348_v10 = vrot.slane %v2437_v47, %v2461_v53  ;;  %v474_v11 = vrot.slane %v2447_v49, %v2461_v53  ;;  %v520_v12 = vrot.slane %v2452_v50, %v2458_v52  ;;  %p2155_p11 = scmp.ne.s32.totalorder %s2741_s22, %s2154_s12  ;;  %p2162_p1 = scmp.lt.s32.totalorder %s2160_s18, %s2154_s12 }
  0x1f   : > { %1969 = vmatprep.subr.bf16.mxu1 %v2101_v26  ;;  %v411_v13 = vrot.slane %v2442_v48, %v2461_v53  ;;  %v356_v14 = vrot.slane %v2437_v47, %v2470_v57  ;;  %v419_v15 = vrot.slane %v2442_v48, %v2470_v57  ;;  %v482_v20 = vrot.slane %v2447_v49, %v2470_v57 }
  0x20   : > { %1948 = vmatpush3.bf16.msra.mxu0 %v2102_v27  ;;  %p2156_p12 = pnand %p2155_p11, %p2305_p5  ;;  %p2163_p2 = por %p2162_p1, %p2161_p0 }
  0x21   : > { %382 = vadd.xlane.f32.xlu0 %v381_v16  ;;  %1970 = vmatpush3.bf16.msra.mxu1 %v2103_v28 }
  0x22   : > { %1949 = vmatprep.subr.bf16.mxu0 %v2104_v29  ;;  %1971 = vmatprep.subr.bf16.mxu1 %v2105_v30  ;;  %p2157_p13 = pneg %p2156_p12 }
  0x24   : > { %1950 = vmatpush3.bf16.msra.mxu0 %v2106_v31  ;;  %p2164_p3 = pnand %p2163_p2, %p2157_p13 }
  0x25   : > { %1972 = vmatpush3.bf16.msra.mxu1 %v2107_v32  ;;  %1951 = vmatprep.subr.bf16.mxu0 %v2108_v33 }
  0x26   : > { %1973 = vmatprep.subr.bf16.mxu1 %v2109_v34 }
  0x28   : > { %1952 = vmatpush3.bf16.msra.mxu0 %v2110_v35 }
  0x29   : > { %1974 = vmatpush3.bf16.msra.mxu1 %v2111_v36  ;;  %1953 = vmatprep.subr.bf16.mxu0 %v2112_v37 }
  0x2a   : > { %1975 = vmatprep.subr.bf16.mxu1 %v2113_v38 }
  0x2c   : > { %1954 = vmatpush3.bf16.msra.mxu0 %v2114_v39 }
  0x2d   : > { %1976 = vmatpush3.bf16.msra.mxu1 %v2115_v40  ;;  %1983 = vmatprep.subr.bf16.mxu0 %v2116_v41 }
  0x2e   : > { %2005 = vmatprep.subr.bf16.mxu1 %v2117_v42  ;;  %v532_v42 = vrot.slane %v2452_v50, %v2461_v53 }
  0xaa   : > { %v321_v62 = vpop.xlane.xlu0 %320 }
  0xab   : > { %v2488_v3 = vmul.f32 0.00390625, %v321_v62  ;;  %v446_v4 = vpop.xlane.xlu1 %445 }
  0xac   : > { %v2496_v8 = vmul.f32 0.00390625, %v446_v4 }
  0xad   : > { %v366_v17 = vmul.f32 %v332_v54, %v2488_v3  ;;  %v368_v18 = vmul.f32 %v340_v59, %v2488_v3  ;;  %v365_v19 = vmul.f32 %v328_v0, %v2488_v3  ;;  %v367_v24 = vmul.f32 %v336_v6, %v2488_v3 }
  0xae   : > { %v383_v16 = vpop.xlane.xlu0 %382  ;;  %v492_v22 = vmul.f32 %v458_v56, %v2496_v8  ;;  %v494_v23 = vmul.f32 %v466_v61, %v2496_v8  ;;  %v491_v25 = vmul.f32 %v454_v2, %v2496_v8  ;;  %v493_v26 = vmul.f32 %v462_v9, %v2496_v8 }
  0xaf   : > { %v2517_v21 = vmul.f32 0.00390625, %v383_v16  ;;  %v370_v27 = vmul.f32 %v348_v10, %v2488_v3  ;;  %v496_v28 = vmul.f32 %v474_v11, %v2496_v8  ;;  %v372_v34 = vmul.f32 %v356_v14, %v2488_v3  ;;  %v2121_v14 = vld [vmem:[%s2789_s3 + $0x1c8] sm:$0xff]  }
  0xb0   : > { %v498_v36 = vmul.f32 %v482_v20, %v2496_v8  ;;  %v2125_v20 = vld [vmem:[%s2789_s3 + $0x1d0] sm:$0xff]  }
  0xb1   : > { %v429_v29 = vmul.f32 %v395_v55, %v2517_v21  ;;  %v431_v30 = vmul.f32 %v403_v60, %v2517_v21  ;;  %v428_v31 = vmul.f32 %v391_v1, %v2517_v21  ;;  %v430_v32 = vmul.f32 %v399_v7, %v2517_v21 }
  0xb2   : > { %v433_v33 = vmul.f32 %v411_v13, %v2517_v21  ;;  %v435_v35 = vmul.f32 %v419_v15, %v2517_v21  ;;  %v540_v55 = vrot.slane %v2452_v50, %v2470_v57  ;;  %v2120_v13 = vld [vmem:[%s2789_s3 + $0x148] sm:$0xff]  }
  0xb3   : > { %v437_v37 = vadd.f32 %v429_v29, %v366_v17  ;;  %v439_v38 = vadd.f32 %v431_v30, %v368_v18  ;;  %v436_v39 = vadd.f32 %v428_v31, %v365_v19  ;;  %v438_v40 = vadd.f32 %v430_v32, %v367_v24  ;;  %v2122_v17 = vld [vmem:[%s2789_s3 + $0x108] sm:$0xff]   ;;  %v2124_v19 = vld [vmem:[%s2789_s3 + $0x150] sm:$0xff]   ;;  %v2128_v24 = vld [vmem:[%s2789_s3 + $0x158] sm:$0xff]  }
  0xb4   : > { %v441_v41 = vadd.f32 %v433_v33, %v370_v27  ;;  %v443_v54 = vadd.f32 %v435_v35, %v372_v34  ;;  %v2123_v18 = vld [vmem:[%s2789_s3 + $0x188] sm:$0xff]   ;;  %v2602_v27 = vsub.s32 6, %v2426_v44  ;;  %v2131_v29 = vld [vmem:[%s2789_s3 + $0x198] sm:$0xff]   ;;  %v2132_v30 = vld [vmem:[%s2789_s3 + $0x160] sm:$0xff]  }
  0xb5   : > { %v500_v56 = vadd.f32 %v492_v22, %v437_v37  ;;  %v502_v59 = vadd.f32 %v494_v23, %v439_v38  ;;  %v499_v60 = vadd.f32 %v491_v25, %v436_v39  ;;  %v501_v61 = vadd.f32 %v493_v26, %v438_v40  ;;  %v2126_v22 = vld [vmem:[%s2789_s3 + $0x110] sm:$0xff]   ;;  %v2129_v25 = vld [vmem:[%s2789_s3 + $0x1d8] sm:$0xff]   ;;  %v2133_v31 = vld [vmem:[%s2789_s3 + $0x1e0] sm:$0xff]  }
  0xb6   : > { %v504_v62 = vadd.f32 %v496_v28, %v441_v41  ;;  %v506_v0 = vadd.f32 %v498_v36, %v443_v54  ;;  %v2127_v23 = vld [vmem:[%s2789_s3 + $0x190] sm:$0xff]   ;;  %v2599_v26 = vsub.s32 4, %v2426_v44  ;;  %v2130_v28 = vld [vmem:[%s2789_s3 + $0x118] sm:$0xff]   ;;  %v415_v33 = vrot.slane %v2442_v48, %v2602_v27  ;;  %v2134_v36 = vld [vmem:[%s2789_s3 + $0x120] sm:$0xff]  }
  0xb7   : > { %v2538_v1 = vadd.f32 %v516_v58, %v500_v56  ;;  %v2540_v2 = vadd.f32 %v524_v63, %v502_v59  ;;  %v2542_v4 = vadd.f32 %v512_v5, %v499_v60  ;;  %v2544_v6 = vadd.f32 %v520_v12, %v501_v61  ;;  %v2118_v5 = vld [vmem:[%s2789_s3 + $0x100] sm:$0xff]   ;;  %v2139_v56 = vld [vmem:[%s2789_s3 + $0x1a8] sm:$0xff]  }
  0xb8   : > { %v2546_v7 = vadd.f32 %v532_v42, %v504_v62  ;;  %v2548_v9 = vadd.f32 %v540_v55, %v506_v0  ;;  %v2119_v12 = vld [vmem:[%s2789_s3 + $0x180] sm:$0xff]   ;;  %v407_v32 = vrot.slane %v2442_v48, %v2599_v26  ;;  %v344_v34 = vrot.slane %v2437_v47, %v2599_v26  ;;  %v2136_v48 = vld [vmem:[%s2789_s3 + $0x168] sm:$0xff]   ;;  %v2142_v62 = vld [vmem:[%s2789_s3 + $0x130] sm:$0xff]  }
  0xb9   : > { %v558_v10 = vpack.c.bf16 %v2538_v1, %v2538_v1  ;;  %v560_v11 = vpack.c.bf16 %v2540_v2, %v2540_v2  ;;  %v557_v58 = vpack.c.bf16 %v2542_v4, %v2542_v4  ;;  %v559_v63 = vpack.c.bf16 %v2544_v6, %v2544_v6  ;;  %v2135_v37 = vld [vmem:[%s2789_s3 + $0x1a0] sm:$0xff]   ;;  %v2138_v55 = vld [vmem:[%s2789_s3 + $0x128] sm:$0xff]   ;;  %v2143_v0 = vld [vmem:[%s2789_s3 + $0x1b0] sm:$0xff]  }
  0xba   : > { %v562_v15 = vpack.c.bf16 %v2546_v7, %v2546_v7  ;;  %v564_v16 = vpack.c.bf16 %v2548_v9, %v2548_v9  ;;  %v352_v35 = vrot.slane %v2437_v47, %v2602_v27  ;;  %v470_v38 = vrot.slane %v2447_v49, %v2599_v26  ;;  %v2137_v47 = vld [vmem:[%s2789_s3 + $0x1e8] sm:$0xff]  }
  0xbb   : > { %1116 = vmatprep.mubr.bf16.mxu0 %v558_v10  ;;  %1156 = vmatprep.mubr.bf16.mxu1 %v560_v11  ;;  %v432_v39 = vmul.f32 %v407_v32, %v2517_v21  ;;  %v434_v40 = vmul.f32 %v415_v33, %v2517_v21  ;;  %v478_v41 = vrot.slane %v2447_v49, %v2602_v27  ;;  %v2140_v49 = vld [vmem:[%s2789_s3 + $0x170] sm:$0xff]   ;;  %v2144_v11 = vld [vmem:[%s2789_s3 + $0x178] sm:$0xff]  }
  0xbc   : > { %1117 = vmatmul.mubr.bf16.vlgmr.msra.gmra.mrb[0].mxu0 %v557_v58  ;;  %1157 = vmatmul.mubr.bf16.vlgmr.msra.gmra.mrb[0].mxu1 %v559_v63  ;;  %v369_v42 = vmul.f32 %v344_v34, %v2488_v3  ;;  %v371_v54 = vmul.f32 %v352_v35, %v2488_v3  ;;  %v495_v59 = vmul.f32 %v470_v38, %v2496_v8  ;;  %v2141_v3 = vld [vmem:[%s2789_s3 + $0x1f0] sm:$0xff]  }
  0xbd   : > { %1984 = vmatpush3.bf16.msra.mxu0 %v2118_v5  ;;  %2006 = vmatpush3.bf16.msra.mxu1 %v2119_v12  ;;  %v497_v61 = vmul.f32 %v478_v41, %v2496_v8  ;;  %v528_v10 = vrot.slane %v2452_v50, %v2599_v26  ;;  %v2145_v8 = vld [vmem:[%s2789_s3 + $0x1f8] sm:$0xff]   ;;  %v536_v5 = vrot.slane %v2452_v50, %v2602_v27 }
  0xbe   : > { %1196 = vmatprep.mubr.bf16.mxu0 %v562_v15  ;;  %1236 = vmatprep.mubr.bf16.mxu1 %v564_v16  ;;  %v440_v21 = vadd.f32 %v432_v39, %v369_v42  ;;  %v442_v60 = vadd.f32 %v434_v40, %v371_v54  ;;  %v2146_v12 = vld [vmem:[%s2789_s3 + $0x138] sm:$0xff]   ;;  %v1245_v42 = vld [vmem:[%s2791_s5] sm:$0x1] }
  0xbf   : > { %1985 = vmatprep.subr.bf16.mxu0 %v2120_v13  ;;  %2007 = vmatprep.subr.bf16.mxu1 %v2121_v14  ;;  %v2147_v13 = vld [vmem:[%s2789_s3 + $0x1b8] sm:$0xff]  }
  0xc0   : > { %v503_v58 = vadd.f32 %v495_v59, %v440_v21  ;;  %v505_v63 = vadd.f32 %v497_v61, %v442_v60 }
  0xc1   : > { %1986 = vmatpush3.bf16.msra.mxu0 %v2122_v17  ;;  %2008 = vmatpush3.bf16.msra.mxu1 %v2123_v18  ;;  %v2218_v17 = vmov 0.0  }
  0xc2   : > { %1987 = vmatprep.subr.bf16.mxu0 %v2124_v19  ;;  %2009 = vmatprep.subr.bf16.mxu1 %v2125_v20  ;;  %v2680_v14 = vadd.f32 %v528_v10, %v503_v58  ;;  %v2682_v15 = vadd.f32 %v536_v5, %v505_v63  ;;  %v1864_v19 = vld [vmem:[%s2790_s4] ss:$0 sm:$0xff] }
  0xc4   : > { %v561_v50 = vpack.c.bf16 %v2680_v14, %v2680_v14  ;;  %v563_v16 = vpack.c.bf16 %v2682_v15, %v2682_v15 }
  0xc5   : > { %1988 = vmatpush3.bf16.msra.mxu0 %v2126_v22  ;;  %2010 = vmatpush3.bf16.msra.mxu1 %v2127_v23 }
  0xc6   : > { %1989 = vmatprep.subr.bf16.mxu0 %v2128_v24  ;;  %2011 = vmatprep.subr.bf16.mxu1 %v2129_v25 }
  0xc9   : > { %1990 = vmatpush3.bf16.msra.mxu0 %v2130_v28  ;;  %2012 = vmatpush3.bf16.msra.mxu1 %v2131_v29 }
  0xca   : > { %1991 = vmatprep.subr.bf16.mxu0 %v2132_v30  ;;  %2013 = vmatprep.subr.bf16.mxu1 %v2133_v31 }
  0xcd   : > { %1992 = vmatpush3.bf16.msra.mxu0 %v2134_v36  ;;  %2014 = vmatpush3.bf16.msra.mxu1 %v2135_v37 }
  0xce   : > { %1993 = vmatprep.subr.bf16.mxu0 %v2136_v48  ;;  %2015 = vmatprep.subr.bf16.mxu1 %v2137_v47 }
  0xd1   : > { %1994 = vmatpush3.bf16.msra.mxu0 %v2138_v55  ;;  %2016 = vmatpush3.bf16.msra.mxu1 %v2139_v56 }
  0xd2   : > { %1995 = vmatprep.subr.bf16.mxu0 %v2140_v49  ;;  %2017 = vmatprep.subr.bf16.mxu1 %v2141_v3 }
  0xd5   : > { %1996 = vmatpush3.bf16.msra.mxu0 %v2142_v62  ;;  %2018 = vmatpush3.bf16.msra.mxu1 %v2143_v0  ;;  %v1689_v62 = vand.u32 127, %v325_v43  ;;  %v2220_v43 = vmov 1.0  }
  0xd6   : > { %1997 = vmatprep.subr.bf16.mxu0 %v2144_v11  ;;  %2019 = vmatprep.subr.bf16.mxu1 %v2145_v8 }
  0xd7   : > { %vm1690_vm3 = vcmp.eq.s32.totalorder %v2426_v44, %v1689_v62 }
  0xd9   : > { %1998 = vmatpush3.bf16.msra.mxu0 %v2146_v12  ;;  %2020 = vmatpush3.bf16.msra.mxu1 %v2147_v13 }
  0xda   : > { %1332 = vmatprep.subr.mxu1 %v2538_v1  ;;  %2031 = vmatprep.subr.mxu0 %v2218_v17 }
  0xdc   : > { %1197 = vmatmul.mubr.bf16.vlgmr.msra.gmra.mrb[4].mxu0 %v561_v50  ;;  %1237 = vmatmul.mubr.bf16.vlgmr.msra.gmra.mrb[4].mxu1 %v563_v16 }
  0xdd   : > { %1333 = vmatpush1.msra.mxu1 %v2542_v4  ;;  %1396 = vmatprep.mubr.f32.mxu1 %v2218_v17 }
  0xde   : > { %1474 = vmatprep.subr.mxu1 %v2546_v7  ;;  %2033 = vmatprep.mubr.msk.f32.mxu0 %vm2219_vm0, %v2218_v17 }
 0x18f   : > { %v1955_v1 = vpop.f32.mrb[0].mxu0  ;;  %v1977_v18 = vpop.f32.mrb[0].mxu1 }
 0x190   : > { %v1956_v20 = vpop.f32.mrb[1].mxu0  ;;  %v1978_v22 = vpop.f32.mrb[1].mxu1 }
 0x191   : > { %v1957_v4 = vadd.f32 %v1956_v20, %v1955_v1  ;;  %v1979_v23 = vadd.f32 %v1978_v22, %v1977_v18  ;;  %v1958_v7 = vpop.f32.mrb[2].mxu0  ;;  %v1980_v24 = vpop.f32.mrb[2].mxu1 }
 0x192   : > { %v1959_v25 = vpop.f32.mrb[3].mxu0  ;;  %v1981_v28 = vpop.f32.mrb[3].mxu1 }
 0x193   : > { %v1119_v29 = vadd.f32 %v1957_v4, %v1864_v19 }
 0x195   : > { %v1159_v30 = vadd.f32 %v1979_v23, %v1119_v29 }
 0x1af   : > { %v1999_v31 = vpop.f32.mrb[4].mxu0  ;;  %v2021_v32 = vpop.f32.mrb[4].mxu1 }
 0x1b0   : > { %v2000_v33 = vpop.f32.mrb[5].mxu0  ;;  %v2022_v34 = vpop.f32.mrb[5].mxu1 }
 0x1b1   : > { %v2001_v35 = vadd.f32 %v2000_v33, %v1999_v31  ;;  %v2023_v36 = vadd.f32 %v2022_v34, %v2021_v32  ;;  %v2002_v37 = vpop.f32.mrb[6].mxu0  ;;  %v2024_v38 = vpop.f32.mrb[6].mxu1 }
 0x1b2   : > { %v2003_v48 = vpop.f32.mrb[7].mxu0  ;;  %v2025_v47 = vpop.f32.mrb[7].mxu1 }
 0x1b3   : > { %v1199_v39 = vadd.f32 %v2001_v35, %v1159_v30 }
 0x1b5   : > { %v1239_v40 = vadd.f32 %v2023_v36, %v1199_v39 }
 0x1b7   : > { %2148 = vtanh.f32 %v1239_v40 }
 0x1c1   : > { %v2149_v41 = vpop.eup %2148 }
 0x1c2   : > { %2032 = vmatpush3.xpose.msra.mxu0 %v2149_v41 }
 0x1c3   : > { %1403 = vmatprep.subr.mxu0 %v2540_v2 }
 0x1c5   : > { %2034 = vmatmul.mubr.f32.vlgmr.msra.gmra.mrb[8].mxu0 %v1245_v42 }
 0x1c6   : > { %1404 = vmatpush1.msra.mxu0 %v2544_v6  ;;  %1467 = vmatprep.mubr.f32.mxu0 %v2218_v17 }
 0x1c7   : > { %1545 = vmatprep.subr.mxu0 %v2548_v9  ;;  %v1616_v9 = vld [vmem:[%s2792_s6] sm:$0xff] }
 0x1c8   : > { %v1621_v44 = vrot.slane %v1616_v9, %v2455_v51  ;;  %v1629_v0 = vrot.slane %v1616_v9, %v2458_v52  ;;  %v1625_v10 = vrot.slane %v1616_v9, %v2429_v45  ;;  %v1633_v58 = vrot.slane %v1616_v9, %v2432_v46 }
 0x1c9   : > { %v1645_v22 = vrot.slane %v1616_v9, %v2602_v27  ;;  %v1649_v7 = vrot.slane %v1616_v9, %v2470_v57 }
 0x298   : > { %v1312_v54 = vpop.f32.mrb[8].mxu0 }
 0x299   : > { %v1317_v55 = vsel %vm1316_vm1, %v1312_v54, -inf  ;;  %v2035_v56 = vpop.f32.mrb[9].mxu0 }
 0x29a   : > { %1318 = vmax.xlane.f32.xlu1 %v1317_v55 }
 0x327   : > { %v1319_v59 = vpop.xlane.xlu1 %1318 }
 0x328   : > { %v1320_v49 = vsub.f32 %v1312_v54, %v1319_v59 }
 0x32a   : > { %v1321_v3 = vmul.f32 1.442695, %v1320_v49 }
 0x32c   : > { %2150 = vpow2.f32 %v1321_v3 }
 0x336   : > { %v2151_v21 = vpop.eup %2150 }
 0x337   : > { %v1323_v60 = vsel %vm1316_vm1, %v2151_v21, 0.0 }
 0x338   : > { %1324 = vadd.xlane.f32.xlu0 %v1323_v60 }
 0x3c5   : > { %v1325_v2 = vpop.xlane.xlu0 %1324 }
 0x3c6   : > { %2152 = vrcp.f32 %v1325_v2 }
 0x3d0   : > { %v2153_v61 = vpop.eup %2152 }
 0x3d1   : > { %v1327_v6 = vmul.f32 %v2153_v61, %v2151_v21 }
 0x3d3   : > { %1929 = vmatmul.mubr.msk.f32.vlgmr.msra.gmra.mrb[8].mxu1 %vm1328_vm2, %v1327_v6  ;;  %1930 = vmatmul.mubr.msk.f32.vlgmr.msra.gmra.mrb[10].mxu0 %vm1328_vm2, %v1327_v6 }
 0x3d4   : > { %1475 = vmatpush1.msra.mxu1 %v2680_v14  ;;  %1546 = vmatpush1.msra.mxu0 %v2682_v15  ;;  %v1637_v15 = vrot.slane %v1616_v9, %v2599_v26 }
 0x3d5   : > { %1538 = vmatprep.mubr.f32.mxu1 %v2218_v17  ;;  %1609 = vmatprep.mubr.f32.mxu0 %v2218_v17 }
 0x3d6   : > { %2036 = vmatprep.subr.mxu1 %v2218_v17 }
 0x3d7   : > { %1931 = vmatmul.mubr.msk.f32.vlgmr.msra.gmra.mrb[10].mxu1 %vm1328_vm2, %v1327_v6  ;;  %1932 = vmatmul.mubr.msk.f32.vlgmr.msra.gmra.mrb[12].mxu0 %vm1328_vm2, %v1327_v6 }
 0x3d8   : > { %2037 = vmatpush3.msk.msra.mxu1 %vm1690_vm3, %v2220_v43  ;;  %2038 = vmatprep.mubr.msk.f32.mxu1 %vm2219_vm0, %v2218_v17  ;;  %v1641_v17 = vrot.slane %v1616_v9, %v2461_v53 }
 0x3db   : > { %2039 = vmatmul.mubr.msk.f32.vlgmr.msra.gmra.mrb[12].mxu1 %vm1328_vm2, %v1327_v6 }
 0x4a6   : > { %v1398_v11 = vpop.f32.mrb[8].mxu1  ;;  %v1469_v8 = vpop.f32.mrb[10].mxu0 }
 0x4a7   : > { %v1658_v63 = vmul.f32 %v1621_v44, %v1398_v11  ;;  %v1400_v5 = vpop.f32.mrb[9].mxu1  ;;  %v1471_v12 = vpop.f32.mrb[11].mxu0  ;;  %v1660_v13 = vmul.f32 %v1629_v0, %v1469_v8 }
 0x4a8   : > { %v1659_v14 = vmul.f32 %v1625_v10, %v1400_v5  ;;  %v1661_v52 = vmul.f32 %v1633_v58, %v1471_v12 }
 0x4a9   : > { %v1667_v50 = vsel %vm1666_vm4, %v1658_v63, 0.0  ;;  %v1670_v19 = vsel %vm1666_vm4, %v1660_v13, 0.0 }
 0x4aa   : > { %v1668_v51 = vsel %vm1666_vm4, %v1659_v14, 0.0  ;;  %v1540_v45 = vpop.f32.mrb[10].mxu1  ;;  %v1611_v16 = vpop.f32.mrb[12].mxu0  ;;  %v1672_v4 = vsel %vm1666_vm4, %v1661_v52, 0.0 }
 0x4ab   : > { %v1669_v1 = vadd.f32 %v1668_v51, %v1667_v50  ;;  %v1542_v46 = vpop.f32.mrb[11].mxu1  ;;  %v1613_v18 = vpop.f32.mrb[13].mxu0  ;;  %v1662_v20 = vmul.f32 %v1637_v15, %v1540_v45  ;;  %v1664_v29 = vmul.f32 %v1645_v22, %v1611_v16 }
 0x4ac   : > { %v1663_v23 = vmul.f32 %v1641_v17, %v1542_v46  ;;  %v1665_v31 = vmul.f32 %v1649_v7, %v1613_v18 }
 0x4ad   : > { %v1671_v26 = vadd.f32 %v1670_v19, %v1669_v1  ;;  %v1674_v28 = vsel %vm1666_vm4, %v1662_v20, 0.0  ;;  %v1678_v33 = vsel %vm1666_vm4, %v1664_v29, 0.0 }
 0x4ae   : > { %v1759_v24 = vpop.f32.mrb[12].mxu1  ;;  %v1676_v27 = vsel %vm1666_vm4, %v1663_v23, 0.0  ;;  %v1680_v34 = vsel %vm1666_vm4, %v1665_v31, 0.0 }
 0x4af   : > { %v1673_v25 = vadd.f32 %v1672_v4, %v1671_v26  ;;  %1763 = vst [vmem:[%s303_s20] sm:$0x1] %v1759_v24  ;;  %v2040_v53 = vpop.f32.mrb[13].mxu1 }
 0x4b1   : > { %v1675_v30 = vadd.f32 %v1674_v28, %v1673_v25 }
 0x4b3   : > { %v1677_v32 = vadd.f32 %v1676_v27, %v1675_v30 }
 0x4b5   : > { %v1679_v57 = vadd.f32 %v1678_v33, %v1677_v32 }
 0x4b7   : > { %v1681_v35 = vadd.f32 %v1680_v34, %v1679_v57 }
 0x4b9   : > { %1682 = vadd.xlane.f32.xlu1 %v1681_v35 }
 0x4ba   : > { %2167 = shalt.err (!%p2164_p3)
}
 0x4bb   : > { %s2168_s9 = scalar_lea.hbm %s1781_s26, 16  ;;  %s2172_s23 = scalar_lea.hbm %s2794_s8, 32 }
 0x4bc   : > { %p2169_p4 = scmp.ne.s32.totalorder %s1781_s26, %s2168_s9  ;;  %p2173_p9 = scmp.lt.u32.totalorder %s1781_s26, %s2794_s8 }
 0x4bd   : > { %p2174_p10 = scmp.lt.u32.totalorder %s2172_s23, %s2168_s9  ;;  %p2176_p12 = scmp.lt.u32.totalorder %s2168_s9, %s1781_s26 }
 0x4be   : > { %p2170_p7 = pnand %p2169_p4, %p2305_p5 }
 0x4bf   : > { %p2175_p11 = por %p2174_p10, %p2173_p9 }
 0x4c0   : > { %p2171_p8 = pneg %p2170_p7 }
 0x4c1   : > { %p2177_p0 = por %p2176_p12, %p2175_p11 }
 0x4c3   : > { %p2178_p13 = pnand %p2177_p0, %p2171_p8 }
 0x4c5   : > { %2181 = shalt.err (!%p2178_p13)
}
 0x4c6   : > { %2042 = dma.vmem_to_hbm [thread:$0]  (%p2305_p5), %s2741_s22, 16, %s1781_s26, %s1768_s10   ;;  %vm1684_vm5 = vcmask 0  }
 0x4c7   : > { %s311_s17 = scalar_lea.vmem %s2793_s7, %s2323_s21 }
 0x546   : > { %v1683_v36 = vpop.xlane.xlu1 %1682 }
 0x547   : > { %1685 = vst.msk [vmem:[%s311_s17] sm:$0x1] %vm1684_vm5, %v1683_v36 }
 0x548 PF: > { %p2048_p1 = scmp.ge.s32.totalorder %s2216_s30, 2  ;;  %s1801_s18 = sand.u32 1, %s2204_s27  }
 0x549   : > { %s1802_s9 = scalar_lea.sflag [#allocation3], %s1801_s18 }
 0x54a   : > { %p2045_p2 = pnand %p2048_p1, %p2309_p6 }
 0x54c   : > { %2199 = dma.done.wait (!%p2045_p2), %s1802_s9, 16  }
 0x54d   : > { %2201 = vsyncadd (!%p2045_p2), %s1802_s9, 4294967280  ;;  %p19_p5 = scmp.ge.s32.totalorder %s2292_s11, 4   ;;  %s2797_s27 = smov %s2208_s28 }
 0x54e   : > { %s2798_s28 = smov %s2212_s29  ;;  %s2799_s29 = smov %s2303_s14 }
 0x54f   : > { %s2800_s30 = smov %s2292_s11  ;;  %21 = sbr.rel (!%p19_p5) target bundleno = 3 (0x3), region = 97 }
 0x556   :  { %1806 = vsyncpa [#allocation3], 1 }
 0x557   :  { %1808 = vsyncpa [#allocation3 + $0x1], 1 }

</bundles_post_ra>
